<compile_context>
chip_gen: v7x
topology: tpu7x:2x2x1
jax: 0.10.0
libtpu: 0.0.40
codegen_flags: <defaults>
</compile_context>

<pallas_src>
import jax
import jax.numpy as jnp
from jax.experimental import pallas as pl
from jax.experimental.pallas import tpu as pltpu

HID = 128            # lane-dense padded hidden width
OUT = 2              # true logit width (output array is (B, 2))
_SINGLE_K_MAX = 2048 # largest input_dim handled as a single full-width K pass
_KSPLIT_TK = 1024    # K tile for very large input_dim


# --------------------------------------------------------------------------
# Kernels
# --------------------------------------------------------------------------
def _mlp_epilogue(h1, b_ref, wt_ref, o_ref):
    """Bias+ReLU of layer 1, then layers 2-4 in bf16 on the MXU (f32 acc)."""
    h = jnp.maximum(h1 + b_ref[0:1, :], 0.0)
    h = jnp.maximum(
        jnp.dot(h.astype(jnp.bfloat16), wt_ref[0],
                preferred_element_type=jnp.float32) + b_ref[1:2, :], 0.0)
    h = jnp.maximum(
        jnp.dot(h.astype(jnp.bfloat16), wt_ref[1],
                preferred_element_type=jnp.float32) + b_ref[2:3, :], 0.0)
    logits = jnp.dot(h.astype(jnp.bfloat16), wt_ref[2],
                     preferred_element_type=jnp.float32) + b_ref[3:4, :]
    # Narrow store: only the 2 real logit lanes go back to HBM.
    o_ref[...] = logits[:, :OUT].astype(o_ref.dtype)


def mlp_kernel_fused(x_ref, w1_ref, b_ref, wt_ref, o_ref):
    """Single-pass kernel (grid = (nb,)): whole input_dim in one dot, no
    accumulator scratch, x cast f32->bf16 in-register."""
    h1 = jnp.dot(x_ref[...].astype(jnp.bfloat16), w1_ref[...],
                 preferred_element_type=jnp.float32)
    _mlp_epilogue(h1, b_ref, wt_ref, o_ref)


def mlp_kernel_ksplit(x_ref, w1_ref, b_ref, wt_ref, o_ref, acc_ref):
    """K-split kernel (grid = (nb, nk)): layer-1 accumulated over the K axis
    in an f32 VMEM scratch; epilogue on the last K step."""
    k = pl.program_id(1)

    @pl.when(k == 0)
    def _():
        acc_ref[...] = jnp.zeros_like(acc_ref)

    acc_ref[...] += jnp.dot(x_ref[...].astype(jnp.bfloat16), w1_ref[...],
                            preferred_element_type=jnp.float32)

    @pl.when(k == pl.num_programs(1) - 1)
    def _():
        _mlp_epilogue(acc_ref[...], b_ref, wt_ref, o_ref)


# --------------------------------------------------------------------------
# Tiling / budget helpers
# --------------------------------------------------------------------------
def _budgets():
    """Generation-aware tile / VMEM budgets (v5e,v6e: 128 MiB; v7x: 64 MiB)."""
    cap = 64 * 2**20                     # conservative fallback (v7x per-core)
    try:
        cap = int(pltpu.get_tpu_info().vmem_capacity_bytes)
    except Exception:
        pass
    tile_budget = int(cap * 0.45)
    vmem_limit = min(int(cap * 0.70), 112 * 2**20)
    max_tb = 4096 if cap >= 96 * 2**20 else 2048
    return tile_budget, vmem_limit, max_tb


def _pick_k_tiling(D):
    """Return (Dp, tk, nk). Small/medium D: one full-width K pass, no padding
    at all (full-dim blocks are legal). Very large D: tk=1024 K split."""
    if D <= _SINGLE_K_MAX:
        return D, D, 1
    tk = _KSPLIT_TK
    Dp = -(-D // tk) * tk
    return Dp, tk, Dp // tk


def _pick_batch_tile(B, tk, tile_budget, max_tb):
    """Largest multiple-of-8 batch tile fitting the budget, with an even tile
    count whenever possible (v7x: 2 TensorCores on the parallel axis)."""
    # Per-row working set: double-buffered f32 x tile + f32 layer-1 result
    # (+ small epilogue slack).
    per_row = 2 * tk * 4 + HID * 4 + 256
    tb_max = max(8, (min(tile_budget // per_row, max_tb) // 8) * 8)
    B8 = -(-B // 8) * 8
    if B8 <= tb_max:
        # Whole batch fits a single tile; split in two when >=16 rows so both
        # TensorCores get work and the tile count is even.
        return (-(-(B8 // 2) // 8) * 8) if B8 >= 16 else B8
    nb = -(-B8 // tb_max)
    if nb % 2:
        nb += 1                          # even tile count for 2-TC balance
    tb = -(-B8 // nb)
    return max(8, -(-tb // 8) * 8)


def _pad_to(a, shape):
    return jnp.pad(a, [(0, s - d) for d, s in zip(a.shape, shape)])


def prepare_params(params, Dp):
    """PyTorch-layout params (w: (out,in), b: (out,)) -> kernel operands:
       w1:     (Dp, 128)      bf16 (zero padded)
       b_all:  (8, 128)       f32, rows 0..3 = b1..b4 (zero padded)
       w_tail: (3, 128, 128)  bf16 = [w2, w3, w4] (zero padded)."""
    w1 = _pad_to(params["w1"].T.astype(jnp.bfloat16), (Dp, HID))

    def _w_tile(w):
        return _pad_to(w.T.astype(jnp.bfloat16), (HID, HID))

    w_tail = jnp.stack(
        [_w_tile(params["w2"]), _w_tile(params["w3"]), _w_tile(params["w4"])],
        axis=0)

    def _b_row(b):
        return _pad_to(b.astype(jnp.float32)[None, :], (1, HID))

    b_all = jnp.concatenate(
        [_b_row(params[f"b{i}"]) for i in (1, 2, 3, 4)]
        + [jnp.zeros((4, HID), jnp.float32)], axis=0)       # pad to 8 sublanes
    return w1, b_all, w_tail


# --------------------------------------------------------------------------
# Wrapper
# --------------------------------------------------------------------------
def classifier_forward(x, params, *, tb=None, tk=None):
    """x: (B, input_dim) float32. params: PyTorch-layout weights/biases.
    Returns (B, 2) float32 logits."""
    B, D = x.shape
    tile_budget, vmem_limit, max_tb = _budgets()

    if tk is None:
        Dp, tk, nk = _pick_k_tiling(D)
    else:                                    # explicit override (testing)
        Dp = -(-D // tk) * tk
        nk = Dp // tk
    if tb is None:
        tb = _pick_batch_tile(B, tk, tile_budget, max_tb)
    assert tb % 8 == 0, "batch tile must be a multiple of 8 (sublane tiling)"

    nb = -(-B // tb)
    Bp = nb * tb

    # x stays f32; pad only when shapes require it (never for the common case).
    xp = x
    if (Bp, Dp) != (B, D):
        xp = jnp.pad(xp, ((0, Bp - B), (0, Dp - D)))
    w1, b_all, w_tail = prepare_params(params, Dp)

    if nk == 1:
        kernel = mlp_kernel_fused
        grid = (nb,)
        in_specs = [
            pl.BlockSpec((tb, Dp), lambda i: (i, 0)),          # x (f32)
            pl.BlockSpec((Dp, HID), lambda i: (0, 0)),         # w1 (bf16)
            pl.BlockSpec((8, HID), lambda i: (0, 0)),          # fused biases
            pl.BlockSpec((3, HID, HID), lambda i: (0, 0, 0)),  # fused w2/w3/w4
        ]
        out_specs = pl.BlockSpec((tb, OUT), lambda i: (i, 0))
        scratch = []
        dims = ("parallel",)
    else:
        kernel = mlp_kernel_ksplit
        grid = (nb, nk)
        in_specs = [
            pl.BlockSpec((tb, tk), lambda i, k: (i, k)),
            pl.BlockSpec((tk, HID), lambda i, k: (k, 0)),
            pl.BlockSpec((8, HID), lambda i, k: (0, 0)),
            pl.BlockSpec((3, HID, HID), lambda i, k: (0, 0, 0)),
        ]
        out_specs = pl.BlockSpec((tb, OUT), lambda i, k: (i, 0))
        scratch = [pltpu.VMEM((tb, HID), jnp.float32)]         # layer-1 acc
        dims = ("parallel", "arbitrary")

    out = pl.pallas_call(
        kernel,
        out_shape=jax.ShapeDtypeStruct((Bp, OUT), jnp.float32),
        grid_spec=pltpu.PrefetchScalarGridSpec(
            num_scalar_prefetch=0,
            grid=grid,
            in_specs=in_specs,
            out_specs=out_specs,
            scratch_shapes=scratch,
        ),
        compiler_params=pltpu.CompilerParams(
            dimension_semantics=dims,
            vmem_limit_bytes=vmem_limit,
        ),
    )(xp, w1, b_all, w_tail)

    return out[:B]                               # drop batch padding only


# --------------------------------------------------------------------------
# Reference + init
# --------------------------------------------------------------------------
def init_params(key, input_dim):
    """Deterministic init mimicking PyTorch Linear (uniform +-1/sqrt(fan_in)).
    PyTorch layout: weight (out_features, in_features), bias (out,)."""
    dims = [input_dim, 64, 32, 16, 2]
    params = {}
    keys = jax.random.split(key, 2 * (len(dims) - 1))
    for li in range(len(dims) - 1):
        fan_in, fan_out = dims[li], dims[li + 1]
        bound = 1.0 / (fan_in ** 0.5)
        kw, kb = keys[2 * li], keys[2 * li + 1]
        params[f"w{li + 1}"] = jax.random.uniform(
            kw, (fan_out, fan_in), jnp.float32, -bound, bound)
        params[f"b{li + 1}"] = jax.random.uniform(
            kb, (fan_out,), jnp.float32, -bound, bound)
    return params


def classifier_ref(x, params, *, mixed=False):
    """Pure-JAX reference. mixed=True mirrors the kernel's bf16-MXU/f32-acc
    precision path for all four layers."""
    hp = jax.lax.Precision.HIGHEST
    if mixed:
        def mm(a, w):
            return jnp.dot(a.astype(jnp.bfloat16), w.T.astype(jnp.bfloat16),
                           preferred_element_type=jnp.float32)
    else:
        def mm(a, w):
            return jnp.dot(a, w.T, precision=hp)
    h = jnp.maximum(mm(x, params["w1"]) + params["b1"], 0.0)
    h = jnp.maximum(mm(h, params["w2"]) + params["b2"], 0.0)
    h = jnp.maximum(mm(h, params["w3"]) + params["b3"], 0.0)
    return mm(h, params["w4"]) + params["b4"]


if __name__ == "__main__":
    key = jax.random.PRNGKey(0)
    k_param, k_x, k_param2, k_x2 = jax.random.split(key, 4)

    # Small demo: batch=16 -> two parallel batch tiles; input_dim=32 ->
    # single-pass kernel, no padding anywhere, (B, 2) narrow output.
    batch, input_dim = 16, 32
    params = init_params(k_param, input_dim)
    x = jax.random.normal(k_x, (batch, input_dim), jnp.float32)

    out = jax.block_until_ready(classifier_forward(x, params))
    assert out.shape == (batch, 2) and out.dtype == jnp.float32

    # Tight check vs a reference using the same mixed-precision path.
    ref_mixed = classifier_ref(x, params, mixed=True)
    assert jnp.allclose(out, ref_mixed, atol=5e-3, rtol=5e-3), (
        float(jnp.max(jnp.abs(out - ref_mixed))))

    # Loose sanity check vs the pure-f32 PyTorch-equivalent forward.
    ref_f32 = classifier_ref(x, params, mixed=False)
    assert jnp.allclose(out, ref_f32, atol=5e-2, rtol=5e-2), (
        float(jnp.max(jnp.abs(out - ref_f32))))

    # Also exercise the K-split accumulator path at small shapes (forced tk).
    batch2, input_dim2 = 24, 256
    params2 = init_params(k_param2, input_dim2)
    x2 = jax.random.normal(k_x2, (batch2, input_dim2), jnp.float32)
    out2 = jax.block_until_ready(classifier_forward(x2, params2, tk=128))
    ref2 = classifier_ref(x2, params2, mixed=True)
    assert out2.shape == (batch2, 2)
    assert jnp.allclose(out2, ref2, atol=5e-3, rtol=5e-3), (
        float(jnp.max(jnp.abs(out2 - ref2))))

    print("KERNEL_OK")
</pallas_src>

<mosaic_0001>
module attributes {stable_mosaic.version = 11 : i64} {
  func.func @mlp_kernel_fused(%arg0: i32, %arg1: memref<8x32xf32, #tpu.memory_space<vmem>>, %arg2: memref<32x128xbf16, #tpu.memory_space<vmem>>, %arg3: memref<8x128xf32, #tpu.memory_space<vmem>>, %arg4: memref<3x128x128xbf16, #tpu.memory_space<vmem>>, %arg5: memref<8x2xf32, #tpu.memory_space<vmem>>) attributes {dimension_semantics = [#tpu.dimension_semantics<parallel>], iteration_bounds = array<i64: 2>, scalar_prefetch = 0 : i64, scratch_operands = 0 : i64, tpu.core_type = #tpu.core_type<tc>, window_params = [{transform_indices = @transform_0, window_bounds = array<i64: 8, 32>}, {pipeline_mode = #tpu.pipeline_mode<synchronous>, transform_indices = @transform_1, window_bounds = array<i64: 32, 128>}, {pipeline_mode = #tpu.pipeline_mode<synchronous>, transform_indices = @transform_2, window_bounds = array<i64: 8, 128>}, {pipeline_mode = #tpu.pipeline_mode<synchronous>, transform_indices = @transform_3, window_bounds = array<i64: 3, 128, 128>}, {transform_indices = @transform_4, window_bounds = array<i64: 8, 2>}]} {
    %c0 = arith.constant 0 : index
    %c0_0 = arith.constant 0 : index
    %0 = vector.load %arg1[%c0, %c0_0] : memref<8x32xf32, #tpu.memory_space<vmem>>, vector<8x32xf32>
    %1 = arith.truncf %0 : vector<8x32xf32> to vector<8x32xbf16>
    %c0_1 = arith.constant 0 : index
    %c0_2 = arith.constant 0 : index
    %2 = vector.load %arg2[%c0_1, %c0_2] : memref<32x128xbf16, #tpu.memory_space<vmem>>, vector<32x128xbf16>
    %cst = arith.constant dense<0.000000e+00> : vector<8x128xf32>
    %3 = tpu.matmul %1, %2, %cst {dimension_numbers = #tpu.dot_dimension_numbers<[1], [0], [0], [1], [0, 0, 1, 1], [], []>} : vector<8x32xbf16>, vector<32x128xbf16>, vector<8x128xf32> -> vector<8x128xf32>
    %c0_3 = arith.constant 0 : index
    %c0_4 = arith.constant 0 : index
    %4 = vector.load %arg3[%c0_3, %c0_4] : memref<8x128xf32, #tpu.memory_space<vmem>>, vector<1x128xf32>
    %5 = vector.broadcast %4 : vector<1x128xf32> to vector<8x128xf32>
    %6 = arith.addf %3, %5 : vector<8x128xf32>
    %cst_5 = arith.constant 0.000000e+00 : f32
    %7 = vector.broadcast %cst_5 : f32 to vector<8x128xf32>
    %8 = arith.maximumf %6, %7 : vector<8x128xf32>
    %9 = arith.truncf %8 : vector<8x128xf32> to vector<8x128xbf16>
    %c0_6 = arith.constant 0 : index
    %c0_7 = arith.constant 0 : index
    %c0_8 = arith.constant 0 : index
    %10 = vector.load %arg4[%c0_6, %c0_7, %c0_8] : memref<3x128x128xbf16, #tpu.memory_space<vmem>>, vector<1x128x128xbf16>
    %11 = vector.shape_cast %10 : vector<1x128x128xbf16> to vector<128x128xbf16>
    %cst_9 = arith.constant dense<0.000000e+00> : vector<8x128xf32>
    %12 = tpu.matmul %9, %11, %cst_9 {dimension_numbers = #tpu.dot_dimension_numbers<[1], [0], [0], [1], [0, 0, 1, 1], [], []>} : vector<8x128xbf16>, vector<128x128xbf16>, vector<8x128xf32> -> vector<8x128xf32>
    %c1 = arith.constant 1 : index
    %c0_10 = arith.constant 0 : index
    %13 = vector.load %arg3[%c1, %c0_10] : memref<8x128xf32, #tpu.memory_space<vmem>>, vector<1x128xf32>
    %14 = vector.broadcast %13 : vector<1x128xf32> to vector<8x128xf32>
    %15 = arith.addf %12, %14 : vector<8x128xf32>
    %cst_11 = arith.constant 0.000000e+00 : f32
    %16 = vector.broadcast %cst_11 : f32 to vector<8x128xf32>
    %17 = arith.maximumf %15, %16 : vector<8x128xf32>
    %18 = arith.truncf %17 : vector<8x128xf32> to vector<8x128xbf16>
    %c1_12 = arith.constant 1 : index
    %c0_13 = arith.constant 0 : index
    %c0_14 = arith.constant 0 : index
    %19 = vector.load %arg4[%c1_12, %c0_13, %c0_14] : memref<3x128x128xbf16, #tpu.memory_space<vmem>>, vector<1x128x128xbf16>
    %20 = vector.shape_cast %19 : vector<1x128x128xbf16> to vector<128x128xbf16>
    %cst_15 = arith.constant dense<0.000000e+00> : vector<8x128xf32>
    %21 = tpu.matmul %18, %20, %cst_15 {dimension_numbers = #tpu.dot_dimension_numbers<[1], [0], [0], [1], [0, 0, 1, 1], [], []>} : vector<8x128xbf16>, vector<128x128xbf16>, vector<8x128xf32> -> vector<8x128xf32>
    %c2 = arith.constant 2 : index
    %c0_16 = arith.constant 0 : index
    %22 = vector.load %arg3[%c2, %c0_16] : memref<8x128xf32, #tpu.memory_space<vmem>>, vector<1x128xf32>
    %23 = vector.broadcast %22 : vector<1x128xf32> to vector<8x128xf32>
    %24 = arith.addf %21, %23 : vector<8x128xf32>
    %cst_17 = arith.constant 0.000000e+00 : f32
    %25 = vector.broadcast %cst_17 : f32 to vector<8x128xf32>
    %26 = arith.maximumf %24, %25 : vector<8x128xf32>
    %27 = arith.truncf %26 : vector<8x128xf32> to vector<8x128xbf16>
    %c2_18 = arith.constant 2 : index
    %c0_19 = arith.constant 0 : index
    %c0_20 = arith.constant 0 : index
    %28 = vector.load %arg4[%c2_18, %c0_19, %c0_20] : memref<3x128x128xbf16, #tpu.memory_space<vmem>>, vector<1x128x128xbf16>
    %29 = vector.shape_cast %28 : vector<1x128x128xbf16> to vector<128x128xbf16>
    %cst_21 = arith.constant dense<0.000000e+00> : vector<8x128xf32>
    %30 = tpu.matmul %27, %29, %cst_21 {dimension_numbers = #tpu.dot_dimension_numbers<[1], [0], [0], [1], [0, 0, 1, 1], [], []>} : vector<8x128xbf16>, vector<128x128xbf16>, vector<8x128xf32> -> vector<8x128xf32>
    %c3 = arith.constant 3 : index
    %c0_22 = arith.constant 0 : index
    %31 = vector.load %arg3[%c3, %c0_22] : memref<8x128xf32, #tpu.memory_space<vmem>>, vector<1x128xf32>
    %32 = vector.broadcast %31 : vector<1x128xf32> to vector<8x128xf32>
    %33 = arith.addf %30, %32 : vector<8x128xf32>
    %34 = vector.extract_strided_slice %33 {offsets = [0, 0], sizes = [8, 2], strides = [1, 1]} : vector<8x128xf32> to vector<8x2xf32>
    %c0_23 = arith.constant 0 : index
    %c0_24 = arith.constant 0 : index
    %35 = vector.load %arg5[%c0_23, %c0_24] : memref<8x2xf32, #tpu.memory_space<vmem>>, vector<8x2xf32>
    tpu.vector_store %arg5[%c0_23, %c0_24], %34 {strides = array<i32>} : memref<8x2xf32, #tpu.memory_space<vmem>>, vector<8x2xf32>,
    return
  }
  func.func @transform_0(%arg0: i32) -> (i32, i32) {
    %c0_i32 = arith.constant 0 : i32
    %c0_i32_0 = arith.constant 0 : i32
    return %arg0, %c0_i32 : i32, i32
  }
  func.func @transform_1(%arg0: i32) -> (i32, i32) {
    %c0_i32 = arith.constant 0 : i32
    %c0_i32_0 = arith.constant 0 : i32
    %c0_i32_1 = arith.constant 0 : i32
    return %c0_i32, %c0_i32_0 : i32, i32
  }
  func.func @transform_2(%arg0: i32) -> (i32, i32) {
    %c0_i32 = arith.constant 0 : i32
    %c0_i32_0 = arith.constant 0 : i32
    %c0_i32_1 = arith.constant 0 : i32
    return %c0_i32, %c0_i32_0 : i32, i32
  }
  func.func @transform_3(%arg0: i32) -> (i32, i32, i32) {
    %c0_i32 = arith.constant 0 : i32
    %c0_i32_0 = arith.constant 0 : i32
    %c0_i32_1 = arith.constant 0 : i32
    %c0_i32_2 = arith.constant 0 : i32
    return %c0_i32, %c0_i32_0, %c0_i32_1 : i32, i32, i32
  }
  func.func @transform_4(%arg0: i32) -> (i32, i32) {
    %c0_i32 = arith.constant 0 : i32
    %c0_i32_0 = arith.constant 0 : i32
    return %arg0, %c0_i32 : i32, i32
  }
}

</mosaic_0001>

<bundles_post_ra>
// kernel: tpu_custom_call.1
= control target key start
LH: loop header
LB: loop body
LE: loop exit
PB: predicated region body
PF: predicated region fallthrough
CT: control target
= control target key end

     0   :  { %9 = vsyncpa [#allocation3], 0  ;;  %s1434_s0 = inlined_call_operand.hbm [shape: f32[16,32], index: 0, kind: input, shape index: {}]   ;;  %s1435_s1 = inlined_call_operand.hbm [shape: bf16[32,128], index: 1, kind: input, shape index: {}]   ;;  %s1436_s2 = inlined_call_operand.hbm [shape: f32[8,128], index: 2, kind: input, shape index: {}]   ;;  %s1437_s3 = inlined_call_operand.hbm [shape: bf16[3,128,128], index: 3, kind: input, shape index: {}]   ;;  %s1438_s4 = inlined_call_operand.vmem [shape: f32[16,2], index: 4, kind: output, shape index: {}]  }
   0x1   :  { %11 = vsyncpa [#allocation3 + $0x1], 0 }
   0x2   :  { %12 = vsyncpa [#allocation5], 0 }
   0x3   :  { %13 = vsyncpa [#allocation8], 0  ;;  %s1190_s15 = smov 0   ;;  %s1192_s16 = smov 0  }
   0x4   :  { %s1194_s17 = smov 0   ;;  %s1196_s18 = smov 0  }
   0x5 LB: > { %s1209_s19 = sadd.s32 4294967295, %s1155_s18   ;;  %p39_p0 = scmp.ne.s32.totalorder %s1147_s16, %s1143_s15  ;;  %s1155_s18 = sphi %s1196_s18, %s1456_s18   ;;  %s1151_s17 = sphi %s1194_s17, %s1455_s17   ;;  %s1147_s16 = sphi %s1192_s16, %s1454_s16   ;;  %s1143_s15 = sphi %s1190_s15, %s1453_s15  }
   0x6   : > { %p1439_p1 = scmp.eq.s32.totalorder %s1209_s19, 0  ;;  %p755_p2 = scmp.ge.s32.totalorder %s1155_s18, 1 }
   0x7   : > { %p139_p3 = scmp.lt.s32.totalorder %s1155_s18, 3  ;;  %s1157_s22 = smov [#allocation4]  }
   0x8   : > { %p1217_p4 = por %p1439_p1, %p39_p0  ;;  %s151_s23 = sshll.u32 %s1157_s22, 4  ;;  %s1225_s23 = int_to_ptr.vmem [resolvable:$true] %s151_s23 }
   0x9   : > { %p1221_p5 = pnand %p755_p2, %p139_p3  ;;  %s1158_s25 = smov [#allocation6]  }
   0xa   : > { %s1442_s20 = scalar_select %p1217_p4, 1, 0 }
   0xb   : > { %s1443_s21 = scalar_select %p1221_p5, 1, 0 }
   0xc   : > { %p913_p6 = pneg %p1221_p5  ;;  %s165_s26 = sshll.u32 %s1158_s25, 4  ;;  %s1235_s26 = int_to_ptr.vmem [resolvable:$true] %s165_s26 }
   0xd   : > { %s1159_s27 = smov [#allocation7]   ;;  %s999_s5 = scalar_lea.hbm %s1435_s1, 256 }
   0xe   : > { %p1231_p7 = pnand %p913_p6, %p1439_p1  ;;  %s1237_s28 = sshll.u32 %s1159_s27, 4  ;;  %s176_s28 = int_to_ptr.vmem [resolvable:$true] %s1237_s28 }
   0xf   : > { %p1000_p8 = scmp.ne.s32.totalorder %s1435_s1, %s999_s5  ;;  %p1006_p12 = scmp.lt.u32.totalorder %s999_s5, %s1435_s1 }
  0x10   : > { %p1247_p9 = pneg %p1231_p7 }
  0x12   : > { %p1002_p10 = pnand %p1247_p9, %p1000_p8 }
  0x14   : > { %p1003_p11 = pneg %p1002_p10 }
  0x16   : > { %p1008_p13 = pnand %p1006_p12, %p1003_p11 }
  0x18   : > { %1011 = shalt.err (!%p1008_p13)
}
  0x19   : > { %s1012_s11 = scalar_lea.vmem %s1225_s23, 256  ;;  %p1020_p6 = scmp.lt.s32.totalorder %s1225_s23, %s1225_s23 }
  0x1a   : > { %p1013_p0 = scmp.ne.s32.totalorder %s1225_s23, %s1012_s11  ;;  %p1021_p1 = scmp.lt.s32.totalorder %s1012_s11, %s1012_s11 }
  0x1c   : > { %p1015_p2 = pnand %p1013_p0, %p1247_p9  ;;  %p1022_p8 = por %p1021_p1, %p1020_p6 }
  0x1e   : > { %p1016_p3 = pneg %p1015_p2 }
  0x20   : > { %p1023_p10 = pnand %p1022_p8, %p1016_p3 }
  0x22   : > { %1026 = shalt.err (!%p1023_p10)
}
  0x23   : > { %s1160_s12 = smov 64   ;;  %s1161_s13 = smov 4  }
  0x24   : > { %916 = dma.hbm_to_vmem [thread:$0]  (!%p1231_p7), %s1435_s1, 256, %s1225_s23, [#allocation5], %s1160_s12, %s1160_s12, %s1161_s13  }
  0x25   : > { %s1027_s27 = scalar_lea.hbm %s1436_s2, 128 }
  0x26   : > { %p1028_p1 = scmp.ne.s32.totalorder %s1436_s2, %s1027_s27  ;;  %p1034_p13 = scmp.lt.u32.totalorder %s1027_s27, %s1436_s2 }
  0x28   : > { %p1030_p11 = pnand %p1028_p1, %p1247_p9 }
  0x2a   : > { %p1031_p12 = pneg %p1030_p11 }
  0x2c   : > { %p1036_p0 = pnand %p1034_p13, %p1031_p12 }
  0x2e   : > { %1039 = shalt.err (!%p1036_p0)
}
  0x2f   : > { %s1040_s23 = scalar_lea.vmem %s1235_s26, 128  ;;  %p1048_p8 = scmp.lt.s32.totalorder %s1235_s26, %s1235_s26 }
  0x30   : > { %p1041_p2 = scmp.ne.s32.totalorder %s1235_s26, %s1040_s23  ;;  %p1049_p10 = scmp.lt.s32.totalorder %s1040_s23, %s1040_s23 }
  0x32   : > { %p1043_p3 = pnand %p1041_p2, %p1247_p9  ;;  %p1050_p1 = por %p1049_p10, %p1048_p8 }
  0x34   : > { %p1044_p6 = pneg %p1043_p3 }
  0x36   : > { %p1051_p11 = pnand %p1050_p1, %p1044_p6 }
  0x38   : > { %1054 = shalt.err (!%p1051_p11)
}
  0x39   : > { %919 = dma.hbm_to_vmem [thread:$0]  (!%p1231_p7), %s1436_s2, 128, %s1235_s26, [#allocation5]  }
  0x3a   : > { %s1055_s14 = scalar_lea.hbm %s1437_s3, 3072 }
  0x3b   : > { %p1056_p12 = scmp.ne.s32.totalorder %s1437_s3, %s1055_s14  ;;  %p1062_p2 = scmp.lt.u32.totalorder %s1055_s14, %s1437_s3 }
  0x3d   : > { %p1058_p13 = pnand %p1056_p12, %p1247_p9 }
  0x3f   : > { %p1059_p0 = pneg %p1058_p13 }
  0x41   : > { %p1064_p3 = pnand %p1062_p2, %p1059_p0 }
  0x43   : > { %1067 = shalt.err (!%p1064_p3)
}
  0x44   : > { %s1068_s29 = scalar_lea.vmem %s176_s28, 3072  ;;  %p1076_p1 = scmp.lt.s32.totalorder %s176_s28, %s176_s28 }
  0x45   : > { %p1069_p6 = scmp.ne.s32.totalorder %s176_s28, %s1068_s29  ;;  %p1077_p11 = scmp.lt.s32.totalorder %s1068_s29, %s1068_s29 }
  0x47   : > { %p1071_p8 = pnand %p1069_p6, %p1247_p9  ;;  %p1078_p4 = por %p1077_p11, %p1076_p1 }
  0x49   : > { %p1072_p10 = pneg %p1071_p8 }
  0x4b   : > { %p1079_p5 = pnand %p1078_p4, %p1072_p10 }
  0x4d   : > { %1082 = shalt.err (!%p1079_p5)
}
  0x4e   : > { %922 = dma.hbm_to_vmem [thread:$0]  (!%p1231_p7), %s1437_s3, 3072, %s176_s28, [#allocation8], %s1160_s12, %s1160_s12, %s1161_s13  }
  0x4f   : > { %s1317_s8 = sadd.s32 1, %s1155_s18   ;;  %s26_s5 = sadd.s32 1, %s1151_s17 }
  0x50   : > { %s23_s24 = ssub.s32 %s1155_s18, %s1317_s8  ;;  %p33_p5 = scmp.ne.s32.totalorder %s1151_s17, %s1147_s16 }
  0x51   : > { %p24_p4 = scmp.eq.s32.totalorder %s23_s24, 0  ;;  %p34_p9 = scmp.eq.s32.totalorder %s1155_s18, 0 }
  0x52   : > { %p930_p12 = scmp.lt.s32.totalorder %s1155_s18, 2  ;;  %s189_s23 = sand.u32 1, %s1151_s17  }
  0x53   : > { %s1327_s6 = scalar_select %p24_p4, %s1151_s17, %s26_s5  }
  0x54   : > { %p35_p13 = por %p34_p9, %p33_p5  ;;  %s760_s7 = sshll.u32 %s189_s23, 3 }
  0x55   : > { %s761_s9 = sshll.u32 %s1155_s18, 7  ;;  %s193_s28 = scalar_lea.vmem [#allocation2], %s760_s7 }
  0x56   : > { %s1334_s14 = scalar_lea.hbm %s1434_s0, %s761_s9  ;;  %s200_s12 = sshll.u32 %s193_s28, 4  ;;  %s1336_s12 = int_to_ptr.vmem [resolvable:$true] %s200_s12 }
  0x57   : > { %p1338_p7 = pnand %p930_p12, %p35_p13  ;;  %s190_s18 = scalar_lea.sflag [#allocation3], %s189_s23 }
  0x58   : > { %s1083_s15 = scalar_lea.hbm %s1334_s14, 128  ;;  %s1088_s27 = scalar_lea.hbm %s1434_s0, 256 }
  0x59   : > { %p1084_p0 = scmp.ne.s32.totalorder %s1334_s14, %s1083_s15  ;;  %p1085_p2 = pneg %p1338_p7 }
  0x5a   : > { %p1089_p8 = scmp.lt.u32.totalorder %s1334_s14, %s1434_s0  ;;  %p1090_p10 = scmp.lt.u32.totalorder %s1088_s27, %s1083_s15 }
  0x5b   : > { %p1086_p3 = pnand %p1085_p2, %p1084_p0  ;;  %p1092_p11 = scmp.lt.u32.totalorder %s1083_s15, %s1334_s14 }
  0x5c   : > { %p1091_p1 = por %p1090_p10, %p1089_p8 }
  0x5d   : > { %p1087_p6 = pneg %p1086_p3 }
  0x5e   : > { %p1093_p4 = por %p1092_p11, %p1091_p1 }
  0x60   : > { %p1094_p5 = pnand %p1093_p4, %p1087_p6 }
  0x62   : > { %1097 = shalt.err (!%p1094_p5)
}
  0x63   : > { %s1098_s30 = scalar_lea.vmem %s1336_s12, 128  ;;  %s1162_s24 = smov [#allocation2]  }
  0x64   : > { %p1099_p9 = scmp.ne.s32.totalorder %s1336_s12, %s1098_s30  ;;  %s1103_s5 = sshll.u32 %s1162_s24, 4  ;;  %s1104_s5 = int_to_ptr.vmem [resolvable:$false] %s1103_s5 }
  0x65   : > { %s1105_s23 = scalar_lea.vmem %s1104_s5, 256  ;;  %p1106_p0 = scmp.lt.s32.totalorder %s1336_s12, %s1104_s5 }
  0x66   : > { %p1101_p12 = pnand %p1099_p9, %p1085_p2  ;;  %p1107_p3 = scmp.lt.s32.totalorder %s1105_s23, %s1098_s30 }
  0x68   : > { %p1102_p13 = pneg %p1101_p12  ;;  %p1108_p8 = por %p1107_p3, %p1106_p0 }
  0x6a   : > { %p1109_p10 = pnand %p1108_p8, %p1102_p13 }
  0x6c   : > { %1112 = shalt.err (!%p1109_p10)
}
  0x6d   : > { %926 = dma.hbm_to_vmem [thread:$0]  (!%p1338_p7), %s1334_s14, 128, %s1336_s12, %s190_s18  }
  0x6e   : > { %p1447_p6 = scmp.ne.s32.totalorder %s1443_s21, 0 }
  0x6f   : > { %s211_s7 = sand.u32 (!%p1447_p6), 1, %s1147_s16   ;;  %p1448_p2 = scmp.ne.s32.totalorder (!%p1447_p6), %s1442_s20, 0 }
  0x70   : > { %209 = sbr.rel (%p1447_p6) target bundleno = 1005 (0x3ed), region = 36  ;;  %s763_s9 = sshll.u32 (!%p1447_p6), %s211_s7, 3 }
  0x71   : > { %s212_s10 = scalar_lea.sflag (!%p1447_p6), [#allocation3], %s211_s7  ;;  %s215_s11 = scalar_lea.vmem (!%p1447_p6), [#allocation2], %s763_s9 }
  0x77   : > { %1130 = dma.done.wait (%p1448_p2), %s212_s10, 128  }
  0x78   : > { %1132 = vsyncadd (%p1448_p2), %s212_s10, 4294967168  ;;  %p1449_p1 = scmp.eq.s32.totalorder %s1209_s19, 0 }
  0x7a   : > { %1134 = dma.done.wait (%p1449_p1), [#allocation5], 384   ;;  %p1450_p11 = pmov %p1449_p1 }
  0x7b   : > { %p1451_p7 = pmov %p1449_p1 }
  0x7c   : > { %1136 = vsyncadd (%p1450_p11), [#allocation5], 4294966912 }
  0x7d   : > { %1138 = dma.done.wait (%p1451_p7), [#allocation8], 3072   ;;  %p1452_p4 = pmov %p1449_p1 }
  0x7e   : > { %v1163_v0 = vmov 0.0   ;;  %vm1164_vm0 = vmmov 0   ;;  %v973_v1 = vld [vmem:[#allocation4] sm:$0xff]   ;;  %v974_v2 = vld [vmem:[#allocation4 + $0x8] sm:$0xff]   ;;  %v256_v3 = vld [vmem:[%s215_s11] sm:$0xff]  ;;  %vm279_vm1 = vcmask 261120  }
  0x7f   : > { %1140 = vsyncadd (%p1452_p4), [#allocation8], 4294964224  ;;  %831 = vmatprep.subr.bf16.mxu0 %v1163_v0  ;;  %835 = vmatprep.mubr.msk.bf16.mxu0 %vm1164_vm0, %v1163_v0  ;;  %v975_v4 = vld [vmem:[#allocation7] sm:$0xff]   ;;  %v257_v5 = vpack.c.bf16 %v256_v3, %v256_v3  ;;  %v976_v6 = vld [vmem:[#allocation7 + $0x8] sm:$0xff]   ;;  %p251_p5 = scmp.lt.s32.totalorder %s1209_s19, 1  ;;  %vm658_vm2 = vcmask 15360  }
  0x80   : > { %839 = vmatprep.subr.bf16.mxu1 %v1163_v0  ;;  %855 = vmatprep.mubr.msk.bf16.mxu1 %vm1164_vm0, %v1163_v0  ;;  %v977_v7 = vld [vmem:[#allocation7 + $0x10] sm:$0xff]   ;;  %v978_v8 = vld [vmem:[#allocation7 + $0x18] sm:$0xff]   ;;  %v979_v9 = vld [vmem:[#allocation7 + $0x20] sm:$0xff]  }
  0x81   : > { %832 = vmatpush3.bf16.msra.mxu0 %v973_v1  ;;  %840 = vmatpush3.bf16.msra.mxu1 %v975_v4  ;;  %v980_v10 = vld [vmem:[#allocation7 + $0x28] sm:$0xff]   ;;  %v981_v11 = vld [vmem:[#allocation7 + $0x30] sm:$0xff]   ;;  %v982_v12 = vld [vmem:[#allocation7 + $0x38] sm:$0xff]   ;;  %s1458_s19 = smov (!%p251_p5, %s1209_s19), 1 }
  0x82   : > { %833 = vmatprep.subr.bf16.mxu0 %v1163_v0  ;;  %841 = vmatprep.subr.bf16.mxu1 %v1163_v0  ;;  %v983_v13 = vld [vmem:[#allocation7 + $0x40] sm:$0xff]   ;;  %v984_v14 = vld [vmem:[#allocation7 + $0x48] sm:$0xff]   ;;  %v985_v15 = vld [vmem:[#allocation7 + $0x50] sm:$0xff]   ;;  %s767_s20 = sshll.u32 %s1458_s19, 3 }
  0x83   : > { %v986_v16 = vld [vmem:[#allocation7 + $0x58] sm:$0xff]   ;;  %v987_v17 = vld [vmem:[#allocation7 + $0x60] sm:$0xff]   ;;  %v988_v18 = vld [vmem:[#allocation7 + $0x68] sm:$0xff]   ;;  %s254_s28 = scalar_lea.vmem %s1438_s4, %s767_s20 }
  0x84   : > { %v768_v19 = vld [vmem:[#allocation6] ss:$0 sm:$0xff]  ;;  %v989_v27 = vld [vmem:[#allocation7 + $0x70] sm:$0xff]   ;;  %v991_v29 = vld [vmem:[#allocation7 + $0x80] sm:$0xff]  }
  0x85   : > { %834 = vmatpush3.bf16.msra.mxu0 %v974_v2  ;;  %842 = vmatpush3.bf16.msra.mxu1 %v976_v6  ;;  %v990_v28 = vld [vmem:[#allocation7 + $0x78] sm:$0xff]   ;;  %v992_v30 = vld [vmem:[#allocation7 + $0x88] sm:$0xff]   ;;  %v993_v31 = vld [vmem:[#allocation7 + $0x90] sm:$0xff]  }
  0x86   : > { %859 = vmatprep.subr.bf16.mxu0 %v1163_v0  ;;  %843 = vmatprep.subr.bf16.mxu1 %v1163_v0  ;;  %v994_v32 = vld [vmem:[#allocation7 + $0x98] sm:$0xff]   ;;  %v995_v33 = vld [vmem:[#allocation7 + $0xa0] sm:$0xff]   ;;  %v996_v34 = vld [vmem:[#allocation7 + $0xa8] sm:$0xff]  }
  0x87   : > { %v772_v35 = vld [vmem:[#allocation6 + $0x1] ss:$0 sm:$0xff]  ;;  %v997_v43 = vld [vmem:[#allocation7 + $0xb0] sm:$0xff]   ;;  %v781_v45 = vld [vmem:[#allocation6 + $0x2] ss:$0 sm:$0xff] }
  0x88   : > { %836 = vmatmul.mubr.msk.bf16.vlgmr.msra.gmra.mrb[0].mxu0 %vm279_vm1, %v257_v5  ;;  %v998_v44 = vld [vmem:[#allocation7 + $0xb8] sm:$0xff]  }
  0x89   : > { %875 = vmatprep.mubr.msk.bf16.mxu0 %vm1164_vm0, %v1163_v0  ;;  %844 = vmatpush3.bf16.msra.mxu1 %v977_v7  ;;  %v790_v53 = vld [vmem:[#allocation6 + $0x3] ss:$0 sm:$0xff] }
  0x8a   : > { %845 = vmatprep.subr.bf16.mxu1 %v1163_v0  ;;  %860 = vmatpush3.bf16.msra.mxu0 %v983_v13 }
  0x8b   : > { %861 = vmatprep.subr.bf16.mxu0 %v1163_v0 }
  0x8d   : > { %846 = vmatpush3.bf16.msra.mxu1 %v978_v8 }
  0x8e   : > { %847 = vmatprep.subr.bf16.mxu1 %v1163_v0  ;;  %862 = vmatpush3.bf16.msra.mxu0 %v984_v14 }
  0x8f   : > { %863 = vmatprep.subr.bf16.mxu0 %v1163_v0 }
  0x91   : > { %848 = vmatpush3.bf16.msra.mxu1 %v979_v9 }
  0x92   : > { %849 = vmatprep.subr.bf16.mxu1 %v1163_v0  ;;  %864 = vmatpush3.bf16.msra.mxu0 %v985_v15 }
  0x93   : > { %865 = vmatprep.subr.bf16.mxu0 %v1163_v0 }
  0x95   : > { %850 = vmatpush3.bf16.msra.mxu1 %v980_v10 }
  0x96   : > { %851 = vmatprep.subr.bf16.mxu1 %v1163_v0  ;;  %866 = vmatpush3.bf16.msra.mxu0 %v986_v16 }
  0x97   : > { %867 = vmatprep.subr.bf16.mxu0 %v1163_v0 }
  0x99   : > { %852 = vmatpush3.bf16.msra.mxu1 %v981_v11 }
  0x9a   : > { %853 = vmatprep.subr.bf16.mxu1 %v1163_v0  ;;  %868 = vmatpush3.bf16.msra.mxu0 %v987_v17 }
  0x9b   : > { %869 = vmatprep.subr.bf16.mxu0 %v1163_v0 }
  0x9d   : > { %854 = vmatpush3.bf16.msra.mxu1 %v982_v12 }
  0x9e   : > { %879 = vmatprep.subr.bf16.mxu1 %v1163_v0  ;;  %870 = vmatpush3.bf16.msra.mxu0 %v988_v18 }
  0x9f   : > { %871 = vmatprep.subr.bf16.mxu0 %v1163_v0 }
  0xa2   : > { %872 = vmatpush3.bf16.msra.mxu0 %v989_v27 }
  0xa3   : > { %873 = vmatprep.subr.bf16.mxu0 %v1163_v0 }
  0xa6   : > { %874 = vmatpush3.bf16.msra.mxu0 %v990_v28 }
 0x15b   : > { %v317_v20 = vpop.f32.mrb[0].mxu0 }
 0x15c   : > { %v318_v21 = vadd.f32 %v768_v19, %v317_v20  ;;  %v837_v22 = vpop.f32.mrb[1].mxu0 }
 0x15d   : > { %v320_v23 = vpop.f32.mrb[2].mxu0 }
 0x15e   : > { %v323_v24 = vmax.f32 %v318_v21, 0.0  ;;  %v838_v25 = vpop.f32.mrb[3].mxu0 }
 0x160   : > { %v324_v26 = vpack.c.bf16 %v323_v24, %v323_v24 }
 0x162   : > { %856 = vmatmul.mubr.bf16.vlgmr.msra.gmra.mrb[0].mxu1 %v324_v26 }
 0x163   : > { %895 = vmatprep.mubr.msk.bf16.mxu1 %vm1164_vm0, %v1163_v0  ;;  %880 = vmatpush3.bf16.msra.mxu1 %v991_v29 }
 0x164   : > { %881 = vmatprep.subr.bf16.mxu1 %v1163_v0 }
 0x167   : > { %882 = vmatpush3.bf16.msra.mxu1 %v992_v30 }
 0x168   : > { %883 = vmatprep.subr.bf16.mxu1 %v1163_v0 }
 0x16b   : > { %884 = vmatpush3.bf16.msra.mxu1 %v993_v31 }
 0x16c   : > { %885 = vmatprep.subr.bf16.mxu1 %v1163_v0 }
 0x16f   : > { %886 = vmatpush3.bf16.msra.mxu1 %v994_v32 }
 0x170   : > { %887 = vmatprep.subr.bf16.mxu1 %v1163_v0 }
 0x173   : > { %888 = vmatpush3.bf16.msra.mxu1 %v995_v33 }
 0x174   : > { %889 = vmatprep.subr.bf16.mxu1 %v1163_v0 }
 0x177   : > { %890 = vmatpush3.bf16.msra.mxu1 %v996_v34 }
 0x178   : > { %891 = vmatprep.subr.bf16.mxu1 %v1163_v0 }
 0x17b   : > { %892 = vmatpush3.bf16.msra.mxu1 %v997_v43 }
 0x17c   : > { %893 = vmatprep.subr.bf16.mxu1 %v1163_v0 }
 0x17f   : > { %894 = vmatpush3.bf16.msra.mxu1 %v998_v44 }
 0x235   : > { %v428_v36 = vpop.f32.mrb[0].mxu1 }
 0x236   : > { %v429_v37 = vadd.f32 %v772_v35, %v428_v36  ;;  %v857_v38 = vpop.f32.mrb[1].mxu1 }
 0x237   : > { %v431_v39 = vpop.f32.mrb[2].mxu1 }
 0x238   : > { %v434_v40 = vmax.f32 %v429_v37, 0.0  ;;  %v858_v41 = vpop.f32.mrb[3].mxu1 }
 0x23a   : > { %v435_v42 = vpack.c.bf16 %v434_v40, %v434_v40 }
 0x23c   : > { %876 = vmatmul.mubr.bf16.vlgmr.msra.gmra.mrb[4].mxu0 %v435_v42 }
 0x30f   : > { %v540_v46 = vpop.f32.mrb[4].mxu0 }
 0x310   : > { %v541_v47 = vadd.f32 %v781_v45, %v540_v46  ;;  %v877_v48 = vpop.f32.mrb[5].mxu0 }
 0x311   : > { %v543_v49 = vpop.f32.mrb[6].mxu0 }
 0x312   : > { %v546_v50 = vmax.f32 %v541_v47, 0.0  ;;  %v878_v51 = vpop.f32.mrb[7].mxu0 }
 0x314   : > { %v547_v52 = vpack.c.bf16 %v546_v50, %v546_v50 }
 0x316   : > { %896 = vmatmul.mubr.bf16.vlgmr.msra.gmra.mrb[4].mxu1 %v547_v52 }
 0x3e9   : > { %v652_v54 = vpop.f32.mrb[4].mxu1 }
 0x3ea   : > { %v653_v55 = vadd.f32 %v790_v53, %v652_v54  ;;  %v897_v56 = vpop.f32.mrb[5].mxu1 }
 0x3eb   : > { %v655_v57 = vpop.f32.mrb[6].mxu1 }
 0x3ec   : > { %659 = vst.msk [vmem:[%s254_s28] sm:$0xff] %vm658_vm2, %v653_v55  ;;  %v898_v58 = vpop.f32.mrb[7].mxu1 }
 0x3ed PF: > { %p16_p9 = scmp.ge.s32.totalorder %s1317_s8, 4   ;;  %s1453_s15 = smov %s1147_s16 }
 0x3ee   : > { %s1454_s16 = smov %s1151_s17  ;;  %s1455_s17 = smov %s1327_s6 }
 0x3ef   : > { %s1456_s18 = smov %s1317_s8  ;;  %18 = sbr.rel (!%p16_p9) target bundleno = 5 (0x5), region = 90 }
 0x3f6   :  { %679 = vsyncpa [#allocation3], 1 }
 0x3f7   :  { %681 = vsyncpa [#allocation3 + $0x1], 1 }
 0x3f8   :  { %682 = vsyncpa [#allocation5], 1 }
 0x3f9   :  { %683 = vsyncpa [#allocation8], 1 }

</bundles_post_ra>
